<compile_context>
chip_gen: v7x
topology: tpu7x:2x2x1
jax: 0.10.0
libtpu: 0.0.40
codegen_flags: <defaults>
</compile_context>

<pallas_src>
import functools

import jax
import jax.numpy as jnp
from jax.experimental import pallas as pl
from jax.experimental.pallas import tpu as pltpu


def _round_up(x, m):
    return (x + m - 1) // m * m


# ---------------- Pallas kernels ----------------

def xw_kernel(x_ref, w_ref, dis_ref, h_ref):
    # H row-tile = d^{-1/2}[rows] * (X row-tile @ W)
    # bf16 operands, f32 MXU accumulation, f32 column scale, bf16 result.
    h = jnp.dot(x_ref[...], w_ref[...], preferred_element_type=jnp.float32)
    h_ref[...] = (h * dis_ref[...]).astype(h_ref.dtype)


def agg_kernel(a_ref, h_ref, dis_ref, b_ref, o_ref, acc_ref, *, tk, resident_h):
    # out row-tile = d^{-1/2}[rows] * sum_k A[rows, k-block] @ H[k-block]  + bias
    k = pl.program_id(1)

    @pl.when(k == 0)
    def _():
        acc_ref[...] = jnp.zeros_like(acc_ref)

    if resident_h:
        # H is fully resident in VMEM (constant block index) — slice the K-slab here.
        k_off = pl.multiple_of(k * tk, tk)
        h_blk = h_ref[pl.ds(k_off, tk), :]
    else:
        h_blk = h_ref[...]

    acc_ref[...] += jnp.dot(a_ref[...], h_blk, preferred_element_type=jnp.float32)

    @pl.when(k == pl.num_programs(1) - 1)
    def _():
        # Row scale + bias applied exactly once, in the single lane-dense finalize store.
        o_ref[...] = (acc_ref[...] * dis_ref[...] + b_ref[...]).astype(o_ref.dtype)


# ---------------- Wrapper ----------------

def gcn_forward(edge_index, x, weight, bias, *, tile=512):
    """edge_index: (2, E) int32; x: (N, nfeat) f32; weight: (nfeat, nhid) f32; bias: (nhid,) f32."""
    n, nfeat = x.shape
    nhid = weight.shape[1]
    src, dst = edge_index[0], edge_index[1]

    # --- tiling / padding choices ---
    tile = min(tile, _round_up(n, 256))            # 256-aligned (v6e/v7x MXU), no over-pad
    n_pad = _round_up(n, tile)
    nfeat_pad = _round_up(max(nfeat, 128), 128)    # dense MXU contraction in stage 1
    nhid_pad = 128 if nhid <= 128 else _round_up(nhid, 256)  # lane-dense output

    # --- glue (O(E) + one padded N^2 bf16 scatter) ---
    # degree = in-degree + self loop (row sums of A[dst, src]); kept in f32.
    deg = jnp.ones((n,), jnp.float32).at[dst].add(1.0)
    dis = jax.lax.rsqrt(deg)                       # deg >= 1, no clamp needed
    dis_p = jnp.zeros((n_pad, 1), jnp.float32).at[:n, 0].set(dis)

    # Unnormalized (A + I) built directly in its final padded bf16 layout.
    # Entries are small integer edge multiplicities -> exact in bf16 (<= 256).
    self_loops = jnp.arange(n, dtype=edge_index.dtype)
    rows = jnp.concatenate([dst, self_loops])      # target node i
    cols = jnp.concatenate([src, self_loops])      # source node j
    adj_p = jnp.zeros((n_pad, n_pad), jnp.bfloat16).at[rows, cols].add(1.0)

    x_p = jnp.zeros((n_pad, nfeat_pad), jnp.bfloat16).at[:n, :nfeat].set(
        x.astype(jnp.bfloat16))
    w_p = jnp.zeros((nfeat_pad, nhid_pad), jnp.bfloat16).at[:nfeat, :nhid].set(
        weight.astype(jnp.bfloat16))
    b_p = jnp.zeros((1, nhid_pad), jnp.float32).at[0, :nhid].set(bias)

    # --- stage 1: H = d^{-1/2} * (X @ W)  (computed once, row-tiled, bf16 out) ---
    h = pl.pallas_call(
        xw_kernel,
        out_shape=jax.ShapeDtypeStruct((n_pad, nhid_pad), jnp.bfloat16),
        grid_spec=pltpu.PrefetchScalarGridSpec(
            num_scalar_prefetch=0,
            grid=(n_pad // tile,),
            in_specs=[
                pl.BlockSpec((tile, nfeat_pad), lambda i: (i, 0)),
                pl.BlockSpec((nfeat_pad, nhid_pad), lambda i: (0, 0)),  # W resident
                pl.BlockSpec((tile, 1), lambda i: (i, 0)),              # d^{-1/2} rows
            ],
            out_specs=pl.BlockSpec((tile, nhid_pad), lambda i: (i, 0)),
        ),
        compiler_params=pltpu.CompilerParams(
            dimension_semantics=("parallel",),
        ),
    )(x_p, w_p, dis_p)

    # --- stage 2: out = d^{-1/2} * (A @ H) + b  (tiled accumulator grid) ---
    # Keep H fully resident in VMEM when it fits (16 MiB guard is v7x-safe);
    # otherwise stream (tile, nhid_pad) K-slabs per step.
    resident_h = (n_pad * nhid_pad * 2) <= (16 * 1024 * 1024)
    if resident_h:
        h_spec = pl.BlockSpec((n_pad, nhid_pad), lambda i, k: (0, 0))
    else:
        h_spec = pl.BlockSpec((tile, nhid_pad), lambda i, k: (k, 0))

    out_p = pl.pallas_call(
        functools.partial(agg_kernel, tk=tile, resident_h=resident_h),
        out_shape=jax.ShapeDtypeStruct((n_pad, nhid_pad), jnp.float32),
        grid_spec=pltpu.PrefetchScalarGridSpec(
            num_scalar_prefetch=0,
            grid=(n_pad // tile, n_pad // tile),   # (row tiles, K blocks) — K last
            in_specs=[
                pl.BlockSpec((tile, tile), lambda i, k: (i, k)),   # A tile (bf16 counts)
                h_spec,                                            # H (resident or slab)
                pl.BlockSpec((tile, 1), lambda i, k: (i, 0)),      # d^{-1/2} rows (f32)
                pl.BlockSpec((1, nhid_pad), lambda i, k: (0, 0)),  # bias (constant)
            ],
            out_specs=pl.BlockSpec((tile, nhid_pad), lambda i, k: (i, 0)),
            scratch_shapes=[pltpu.VMEM((tile, nhid_pad), jnp.float32)],
        ),
        compiler_params=pltpu.CompilerParams(
            dimension_semantics=("parallel", "arbitrary"),
        ),
    )(adj_p, h, dis_p, b_p)

    return out_p[:n, :nhid]


if __name__ == "__main__":
    # Deterministic problem sized so the tiled path is exercised (2x2 stage-2 grid with
    # padding) and the output lane width is native: 600 nodes, 4096 edges, nfeat=64
    # (padded to 128), nhid=128.
    N, E, NFEAT, NHID = 600, 4096, 64, 128

    key = jax.random.PRNGKey(0)
    k_x, k_src, k_dst, k_w, k_b = jax.random.split(key, 5)

    x = jax.random.normal(k_x, (N, NFEAT), dtype=jnp.float32)
    edge_src = jax.random.randint(k_src, (E,), 0, N, dtype=jnp.int32)
    edge_dst = jax.random.randint(k_dst, (E,), 0, N, dtype=jnp.int32)
    edge_index = jnp.stack([edge_src, edge_dst], axis=0)  # (2, E)

    # Glorot-uniform-like W, small random bias (GCNConv(nfeat, nhid) parameter shapes).
    limit = (6.0 / (NFEAT + NHID)) ** 0.5
    weight = jax.random.uniform(k_w, (NFEAT, NHID), minval=-limit, maxval=limit,
                                dtype=jnp.float32)
    bias = 0.1 * jax.random.normal(k_b, (NHID,), dtype=jnp.float32)

    out = jax.block_until_ready(gcn_forward(edge_index, x, weight, bias))

    # Reference in plain f32 JAX (same math, no Pallas). Duplicate edges are counted
    # with multiplicity in both paths (PyG default scatter-add semantics).
    self_loops = jnp.arange(N, dtype=jnp.int32)
    rows = jnp.concatenate([edge_index[1], self_loops])
    cols = jnp.concatenate([edge_index[0], self_loops])
    adj = jnp.zeros((N, N), dtype=jnp.float32).at[rows, cols].add(1.0)
    dis = adj.sum(axis=1) ** -0.5
    a_hat = dis[:, None] * adj * dis[None, :]
    ref = a_hat @ (x @ weight) + bias[None, :]

    assert out.shape == (N, NHID)
    max_err = float(jnp.max(jnp.abs(out - ref)))
    # X / W / H are bf16 MXU operands (f32 accumulation, f32 normalization scales),
    # so tolerance is loosened vs the pure-f32 reference.
    assert jnp.allclose(out, ref, atol=5e-2, rtol=5e-2), f"max abs err {max_err}"
    print("KERNEL_OK")
</pallas_src>

<mosaic_0001>
module attributes {stable_mosaic.version = 11 : i64} {
  func.func @xw_kernel(%arg0: i32, %arg1: memref<512x128xbf16, #tpu.memory_space<vmem>>, %arg2: memref<128x128xbf16, #tpu.memory_space<vmem>>, %arg3: memref<512x1xf32, #tpu.memory_space<vmem>>, %arg4: memref<512x128xbf16, #tpu.memory_space<vmem>>) attributes {dimension_semantics = [#tpu.dimension_semantics<parallel>], iteration_bounds = array<i64: 2>, scalar_prefetch = 0 : i64, scratch_operands = 0 : i64, tpu.core_type = #tpu.core_type<tc>, window_params = [{transform_indices = @transform_0, window_bounds = array<i64: 512, 128>}, {pipeline_mode = #tpu.pipeline_mode<synchronous>, transform_indices = @transform_1, window_bounds = array<i64: 128, 128>}, {transform_indices = @transform_2, window_bounds = array<i64: 512, 1>}, {transform_indices = @transform_3, window_bounds = array<i64: 512, 128>}]} {
    %c0 = arith.constant 0 : index
    %c0_0 = arith.constant 0 : index
    %0 = vector.load %arg1[%c0, %c0_0] : memref<512x128xbf16, #tpu.memory_space<vmem>>, vector<512x128xbf16>
    %c0_1 = arith.constant 0 : index
    %c0_2 = arith.constant 0 : index
    %1 = vector.load %arg2[%c0_1, %c0_2] : memref<128x128xbf16, #tpu.memory_space<vmem>>, vector<128x128xbf16>
    %cst = arith.constant dense<0.000000e+00> : vector<512x128xf32>
    %2 = tpu.matmul %0, %1, %cst {dimension_numbers = #tpu.dot_dimension_numbers<[1], [0], [0], [1], [0, 0, 1, 1], [], []>} : vector<512x128xbf16>, vector<128x128xbf16>, vector<512x128xf32> -> vector<512x128xf32>
    %c0_3 = arith.constant 0 : index
    %c0_4 = arith.constant 0 : index
    %3 = vector.load %arg3[%c0_3, %c0_4] : memref<512x1xf32, #tpu.memory_space<vmem>>, vector<512x1xf32>
    %4 = vector.broadcast %3 : vector<512x1xf32> to vector<512x128xf32>
    %5 = arith.mulf %2, %4 : vector<512x128xf32>
    %6 = arith.truncf %5 : vector<512x128xf32> to vector<512x128xbf16>
    %c0_5 = arith.constant 0 : index
    %c0_6 = arith.constant 0 : index
    %7 = vector.load %arg4[%c0_5, %c0_6] : memref<512x128xbf16, #tpu.memory_space<vmem>>, vector<512x128xbf16>
    tpu.vector_store %arg4[%c0_5, %c0_6], %6 {strides = array<i32>} : memref<512x128xbf16, #tpu.memory_space<vmem>>, vector<512x128xbf16>,
    return
  }
  func.func @transform_0(%arg0: i32) -> (i32, i32) {
    %c0_i32 = arith.constant 0 : i32
    %c0_i32_0 = arith.constant 0 : i32
    return %arg0, %c0_i32 : i32, i32
  }
  func.func @transform_1(%arg0: i32) -> (i32, i32) {
    %c0_i32 = arith.constant 0 : i32
    %c0_i32_0 = arith.constant 0 : i32
    %c0_i32_1 = arith.constant 0 : i32
    return %c0_i32, %c0_i32_0 : i32, i32
  }
  func.func @transform_2(%arg0: i32) -> (i32, i32) {
    %c0_i32 = arith.constant 0 : i32
    %c0_i32_0 = arith.constant 0 : i32
    return %arg0, %c0_i32 : i32, i32
  }
  func.func @transform_3(%arg0: i32) -> (i32, i32) {
    %c0_i32 = arith.constant 0 : i32
    %c0_i32_0 = arith.constant 0 : i32
    return %arg0, %c0_i32 : i32, i32
  }
}

</mosaic_0001>

<bundles_post_ra>
// kernel: tpu_custom_call.1
= control target key start
LH: loop header
LB: loop body
LE: loop exit
PB: predicated region body
PF: predicated region fallthrough
CT: control target
= control target key end

     0   :  { %8 = vsyncpa [#allocation3], 0  ;;  %s2751_s0 = inlined_call_operand.vmem [shape: bf16[1024,128], index: 0, kind: input, shape index: {}]   ;;  %s2752_s1 = inlined_call_operand.vmem [shape: bf16[128,128], index: 1, kind: input, shape index: {}]   ;;  %s2753_s2 = inlined_call_operand.vmem [shape: f32[1024,1], index: 2, kind: input, shape index: {}]   ;;  %s2754_s3 = inlined_call_operand.hbm [shape: bf16[1024,128], index: 3, kind: output, shape index: {}]  }
   0x1   :  { %10 = vsyncpa [#allocation3 + $0x1], 0  ;;  %s2342_s12 = smov 0   ;;  %s2344_s13 = smov 0  }
   0x2   :  { %s2346_s14 = smov 0   ;;  %s2348_s15 = smov 0  }
   0x3 LB: > { %s2363_s16 = sadd.s32 4294967295, %s2316_s15   ;;  %s1660_s17 = sadd.s32 4294967294, %s2316_s15   ;;  %s2316_s15 = sphi %s2348_s15, %s2772_s15   ;;  %s2312_s14 = sphi %s2346_s14, %s2771_s14   ;;  %s2308_s13 = sphi %s2344_s13, %s2770_s13   ;;  %s2304_s12 = sphi %s2342_s12, %s2769_s12  }
   0x4   : > { %s2367_s18 = sadd.s32 1, %s2316_s15   ;;  %s96_s19 = sadd.s32 1, %s2312_s14 }
   0x5   : > { %s93_s20 = ssub.s32 %s2316_s15, %s2367_s18  ;;  %p106_p0 = scmp.ne.s32.totalorder %s2312_s14, %s2308_s13 }
   0x6   : > { %p94_p1 = scmp.eq.s32.totalorder %s93_s20, 0  ;;  %p107_p2 = scmp.eq.s32.totalorder %s2363_s16, 1 }
   0x7   : > { %p112_p3 = scmp.ne.s32.totalorder %s2308_s13, %s2304_s12  ;;  %p113_p4 = scmp.eq.s32.totalorder %s1660_s17, 1 }
   0x8   : > { %s2378_s21 = scalar_select %p94_p1, %s2312_s14, %s96_s19  }
   0x9   : > { %p2380_p5 = por %p107_p2, %p106_p0  ;;  %p2384_p6 = por %p113_p4, %p112_p3 }
   0xa   : > { %p1663_p7 = scmp.ge.s32.totalorder %s2316_s15, 1  ;;  %p152_p8 = scmp.lt.s32.totalorder %s2316_s15, 3 }
   0xc   : > { %p153_p9 = pnand %p1663_p7, %p152_p8 }
   0xe   : > { %156 = sbr.rel (%p153_p9) target bundleno = 345 (0x159), region = 32 }
  0x15   : > { %v2214_v0 = vld [vmem:[%s2752_s1] sm:$0xff]   ;;  %v2318_v1 = vmov 0   ;;  %v2215_v2 = vld [vmem:[%s2752_s1 + $0x8] sm:$0xff]   ;;  %s1665_s28 = sshll.u32 %s2363_s16, 6  ;;  %v2216_v3 = vld [vmem:[%s2752_s1 + $0x10] sm:$0xff]  }
  0x16   : > { %2213 = vset.pattern.permute.xlu1 %v2318_v1  ;;  %2212 = vset.pattern.permute.xlu0 %v2318_v1  ;;  %p182_p10 = scmp.lt.s32.totalorder %s1665_s28, 127  ;;  %v2217_v6 = vld [vmem:[%s2752_s1 + $0x18] sm:$0xff]   ;;  %v2218_v9 = vld [vmem:[%s2752_s1 + $0x20] sm:$0xff]   ;;  %v2219_v14 = vld [vmem:[%s2752_s1 + $0x28] sm:$0xff]  }
  0x17   : > { %2074 = vmatprep.subr.bf16.mxu0 %v2214_v0  ;;  %2154 = vmatprep.subr.bf16.mxu1 %v2214_v0  ;;  %v2220_v17 = vld [vmem:[%s2752_s1 + $0x30] sm:$0xff]   ;;  %v2221_v20 = vld [vmem:[%s2752_s1 + $0x38] sm:$0xff]  }
  0x18   : > { %2075 = vmatpush3.bf16.msra.mxu0 %v2214_v0  ;;  %2162 = vmatpush3.bf16.msra.mxu1 %v2214_v0  ;;  %s2774_s28 = smov (!%p182_p10, %s1665_s28), 127 }
  0x19   : > { %2076 = vmatprep.subr.bf16.mxu0 %v2215_v2  ;;  %2155 = vmatprep.subr.bf16.mxu1 %v2215_v2  ;;  %s1668_s4 = sshll.u32 %s2774_s28, 3  ;;  %s1666_s8 = sshll.u32 %s2774_s28, 2 }
  0x1a   : > { %s2403_s7 = scalar_lea.vmem %s2753_s2, %s1668_s4  ;;  %s2415_s19 = scalar_lea.vmem %s2751_s0, %s1666_s8 }
  0x1b   : > { %v806_v4 = vld [vmem:[%s2403_s7 + $0x10] sm:$0xff]  ;;  %v804_v5 = vld [vmem:[%s2403_s7] sm:$0xff]  ;;  %v807_v7 = vld [vmem:[%s2403_s7 + $0x18] sm:$0xff]  ;;  %s178_s4 = sand.u32 1, %s2308_s13  }
  0x1c   : > { %2077 = vmatpush3.bf16.msra.mxu0 %v2215_v2  ;;  %2163 = vmatpush3.bf16.msra.mxu1 %v2215_v2  ;;  %v805_v8 = vld [vmem:[%s2403_s7 + $0x8] sm:$0xff]  ;;  %v808_v11 = vld [vmem:[%s2403_s7 + $0x20] sm:$0xff]  ;;  %v811_v15 = vld [vmem:[%s2403_s7 + $0x38] sm:$0xff]  ;;  %s1664_s5 = sshll.u32 %s178_s4, 8  ;;  %s2710_s11 = scalar_lea.sflag [#allocation3], %s178_s4 }
  0x1d   : > { %2078 = vmatprep.subr.bf16.mxu0 %v2216_v3  ;;  %2156 = vmatprep.subr.bf16.mxu1 %v2216_v3  ;;  %v809_v10 = vld [vmem:[%s2403_s7 + $0x28] sm:$0xff]  ;;  %v2222_v12 = vld [vmem:[%s2415_s19] sm:$0xff]   ;;  %v810_v16 = vld [vmem:[%s2403_s7 + $0x30] sm:$0xff]  ;;  %s2607_s6 = scalar_lea.vmem [#allocation2], %s1664_s5 }
  0x1e   : > { %880 = vperm.xlu1 %2213, %v806_v4   ;;  %870 = vperm.xlu0 %2212, %v804_v5   ;;  %v2223_v13 = vld [vmem:[%s2415_s19 + $0x80] sm:$0xff]   ;;  %v813_v18 = vld [vmem:[%s2403_s7 + $0x48] sm:$0xff]  ;;  %v815_v21 = vld [vmem:[%s2403_s7 + $0x58] sm:$0xff]  ;;  %s1586_s8 = sshll.u32 %s2607_s6, 4  ;;  %s2702_s8 = int_to_ptr.vmem [resolvable:$true] %s1586_s8 }
  0x1f   : > { %2090 = vmatprep.mubr.bf16.mxu0 %v2222_v12  ;;  %2122 = vmatprep.mubr.bf16.mxu1 %v2223_v13  ;;  %v812_v19 = vld [vmem:[%s2403_s7 + $0x40] sm:$0xff]  ;;  %v814_v22 = vld [vmem:[%s2403_s7 + $0x50] sm:$0xff]  ;;  %v817_v23 = vld [vmem:[%s2403_s7 + $0x68] sm:$0xff]  ;;  %s2254_s17 = scalar_lea.vmem %s2702_s8, 4096 }
  0x20   : > { %2079 = vmatpush3.bf16.msra.mxu0 %v2216_v3  ;;  %2164 = vmatpush3.bf16.msra.mxu1 %v2216_v3  ;;  %v816_v24 = vld [vmem:[%s2403_s7 + $0x60] sm:$0xff]  ;;  %v2224_v25 = vld [vmem:[%s2415_s19 + $0x8] sm:$0xff]   ;;  %v2226_v27 = vld [vmem:[%s2415_s19 + $0x10] sm:$0xff]   ;;  %p2255_p11 = scmp.ne.s32.totalorder %s2702_s8, %s2254_s17 }
  0x21   : > { %2080 = vmatprep.subr.bf16.mxu0 %v2217_v6  ;;  %2157 = vmatprep.subr.bf16.mxu1 %v2217_v6  ;;  %v2225_v26 = vld [vmem:[%s2415_s19 + $0x88] sm:$0xff]   ;;  %v2227_v28 = vld [vmem:[%s2415_s19 + $0x90] sm:$0xff]   ;;  %v819_v29 = vld [vmem:[%s2403_s7 + $0x78] sm:$0xff] }
  0x22   : > { %885 = vperm.xlu1 %2213, %v807_v7   ;;  %875 = vperm.xlu0 %2212, %v805_v8   ;;  %v818_v30 = vld [vmem:[%s2403_s7 + $0x70] sm:$0xff]  ;;  %v821_v31 = vld [vmem:[%s2403_s7 + $0x88] sm:$0xff]  ;;  %v820_v32 = vld [vmem:[%s2403_s7 + $0x80] sm:$0xff]  ;;  %p2256_p12 = pnand %p2255_p11, %p2380_p5 }
  0x23   : > { %v2228_v33 = vld [vmem:[%s2415_s19 + $0x18] sm:$0xff]   ;;  %v2230_v35 = vld [vmem:[%s2415_s19 + $0x20] sm:$0xff]   ;;  %v822_v38 = vld [vmem:[%s2403_s7 + $0x90] sm:$0xff] }
  0x24   : > { %2081 = vmatpush3.bf16.msra.mxu0 %v2217_v6  ;;  %2165 = vmatpush3.bf16.msra.mxu1 %v2217_v6  ;;  %v2229_v34 = vld [vmem:[%s2415_s19 + $0x98] sm:$0xff]   ;;  %v2231_v36 = vld [vmem:[%s2415_s19 + $0xa0] sm:$0xff]   ;;  %v825_v39 = vld [vmem:[%s2403_s7 + $0xa8] sm:$0xff]  ;;  %p2257_p13 = pneg %p2256_p12 }
  0x25   : > { %2082 = vmatprep.subr.bf16.mxu0 %v2218_v9  ;;  %2158 = vmatprep.subr.bf16.mxu1 %v2218_v9  ;;  %v823_v37 = vld [vmem:[%s2403_s7 + $0x98] sm:$0xff]  ;;  %v824_v40 = vld [vmem:[%s2403_s7 + $0xa0] sm:$0xff]  ;;  %v2232_v41 = vld [vmem:[%s2415_s19 + $0x28] sm:$0xff]  }
  0x26   : > { %895 = vperm.xlu1 %2213, %v809_v10   ;;  %890 = vperm.xlu0 %2212, %v808_v11   ;;  %v2233_v42 = vld [vmem:[%s2415_s19 + $0xa8] sm:$0xff]   ;;  %v2234_v43 = vld [vmem:[%s2415_s19 + $0x30] sm:$0xff]   ;;  %v827_v45 = vld [vmem:[%s2403_s7 + $0xb8] sm:$0xff] }
  0x27   : > { %v2235_v44 = vld [vmem:[%s2415_s19 + $0xb0] sm:$0xff]   ;;  %v829_v47 = vld [vmem:[%s2403_s7 + $0xc8] sm:$0xff]  ;;  %v828_v48 = vld [vmem:[%s2403_s7 + $0xc0] sm:$0xff] }
  0x28   : > { %2083 = vmatpush3.bf16.msra.mxu0 %v2218_v9  ;;  %2166 = vmatpush3.bf16.msra.mxu1 %v2218_v9  ;;  %v826_v46 = vld [vmem:[%s2403_s7 + $0xb0] sm:$0xff]  ;;  %v2236_v49 = vld [vmem:[%s2415_s19 + $0x38] sm:$0xff]   ;;  %v2238_v51 = vld [vmem:[%s2415_s19 + $0x40] sm:$0xff]  }
  0x29   : > { %2084 = vmatprep.subr.bf16.mxu0 %v2219_v14  ;;  %2159 = vmatprep.subr.bf16.mxu1 %v2219_v14  ;;  %v2237_v50 = vld [vmem:[%s2415_s19 + $0xb8] sm:$0xff]   ;;  %v2239_v52 = vld [vmem:[%s2415_s19 + $0xc0] sm:$0xff]   ;;  %v830_v54 = vld [vmem:[%s2403_s7 + $0xd0] sm:$0xff] }
  0x2a   : > { %905 = vperm.xlu1 %2213, %v811_v15   ;;  %900 = vperm.xlu0 %2212, %v810_v16   ;;  %v831_v53 = vld [vmem:[%s2403_s7 + $0xd8] sm:$0xff]  ;;  %v833_v55 = vld [vmem:[%s2403_s7 + $0xe8] sm:$0xff]  ;;  %v832_v56 = vld [vmem:[%s2403_s7 + $0xe0] sm:$0xff] }
  0x2b   : > { %v2240_v57 = vld [vmem:[%s2415_s19 + $0x48] sm:$0xff]   ;;  %v2242_v59 = vld [vmem:[%s2415_s19 + $0x50] sm:$0xff]   ;;  %v835_v61 = vld [vmem:[%s2403_s7 + $0xf8] sm:$0xff] }
  0x2c   : > { %2085 = vmatpush3.bf16.msra.mxu0 %v2219_v14  ;;  %2167 = vmatpush3.bf16.msra.mxu1 %v2219_v14  ;;  %v2241_v58 = vld [vmem:[%s2415_s19 + $0xc8] sm:$0xff]   ;;  %v2243_v60 = vld [vmem:[%s2415_s19 + $0xd0] sm:$0xff]   ;;  %v836_v0 = vld [vmem:[%s2403_s7 + $0x100] sm:$0xff] }
  0x2d   : > { %2086 = vmatprep.subr.bf16.mxu0 %v2220_v17  ;;  %2160 = vmatprep.subr.bf16.mxu1 %v2220_v17  ;;  %v834_v62 = vld [vmem:[%s2403_s7 + $0xf0] sm:$0xff]  ;;  %v837_v63 = vld [vmem:[%s2403_s7 + $0x108] sm:$0xff]  ;;  %v2244_v1 = vld [vmem:[%s2415_s19 + $0x58] sm:$0xff]  }
  0x2e   : > { %915 = vperm.xlu1 %2213, %v813_v18   ;;  %910 = vperm.xlu0 %2212, %v812_v19   ;;  %v2245_v2 = vld [vmem:[%s2415_s19 + $0xd8] sm:$0xff]   ;;  %v2246_v3 = vld [vmem:[%s2415_s19 + $0x60] sm:$0xff]   ;;  %v838_v6 = vld [vmem:[%s2403_s7 + $0x110] sm:$0xff] }
  0x2f   : > { %v2247_v4 = vld [vmem:[%s2415_s19 + $0xe0] sm:$0xff]   ;;  %v839_v5 = vld [vmem:[%s2403_s7 + $0x118] sm:$0xff]  ;;  %v841_v7 = vld [vmem:[%s2403_s7 + $0x128] sm:$0xff] }
  0x30   : > { %2087 = vmatpush3.bf16.msra.mxu0 %v2220_v17  ;;  %2168 = vmatpush3.bf16.msra.mxu1 %v2220_v17  ;;  %v840_v8 = vld [vmem:[%s2403_s7 + $0x120] sm:$0xff]  ;;  %v2248_v9 = vld [vmem:[%s2415_s19 + $0x68] sm:$0xff]   ;;  %v2250_v11 = vld [vmem:[%s2415_s19 + $0x70] sm:$0xff]  }
  0x31   : > { %2088 = vmatprep.subr.bf16.mxu0 %v2221_v20  ;;  %2161 = vmatprep.subr.bf16.mxu1 %v2221_v20  ;;  %v2249_v10 = vld [vmem:[%s2415_s19 + $0xe8] sm:$0xff]   ;;  %v2251_v12 = vld [vmem:[%s2415_s19 + $0xf0] sm:$0xff]   ;;  %v843_v13 = vld [vmem:[%s2403_s7 + $0x138] sm:$0xff] }
  0x32   : > { %925 = vperm.xlu1 %2213, %v815_v21   ;;  %920 = vperm.xlu0 %2212, %v814_v22   ;;  %v842_v14 = vld [vmem:[%s2403_s7 + $0x130] sm:$0xff]  ;;  %v845_v15 = vld [vmem:[%s2403_s7 + $0x148] sm:$0xff]  ;;  %v844_v16 = vld [vmem:[%s2403_s7 + $0x140] sm:$0xff] }
  0x33   : > { %v2252_v17 = vld [vmem:[%s2415_s19 + $0x78] sm:$0xff]   ;;  %v849_v21 = vld [vmem:[%s2403_s7 + $0x168] sm:$0xff]  ;;  %v848_v22 = vld [vmem:[%s2403_s7 + $0x160] sm:$0xff] }
  0x34   : > { %2089 = vmatpush3.bf16.msra.mxu0 %v2221_v20  ;;  %2169 = vmatpush3.bf16.msra.mxu1 %v2221_v20  ;;  %v2253_v18 = vld [vmem:[%s2415_s19 + $0xf8] sm:$0xff]   ;;  %v846_v20 = vld [vmem:[%s2403_s7 + $0x150] sm:$0xff]  ;;  %s2319_s19 = smov [#allocation2]  }
  0x35   : > { %v847_v19 = vld [vmem:[%s2403_s7 + $0x158] sm:$0xff]  ;;  %s2258_s20 = sshll.u32 %s2319_s19, 4  ;;  %s2259_s20 = int_to_ptr.vmem [resolvable:$false] %s2258_s20 }
  0x36   : > { %935 = vperm.xlu1 %2213, %v817_v23   ;;  %930 = vperm.xlu0 %2212, %v816_v24   ;;  %v851_v23 = vld [vmem:[%s2403_s7 + $0x178] sm:$0xff]  ;;  %v850_v24 = vld [vmem:[%s2403_s7 + $0x170] sm:$0xff]  ;;  %s2260_s24 = scalar_lea.vmem %s2259_s20, 8192  ;;  %p2261_p0 = scmp.lt.s32.totalorder %s2702_s8, %s2259_s20 }
  0x37   : > { %2091 = vmatmul.mubr.bf16.vlgmr.msra.gmra.mrb[0].mxu0 %v2224_v25  ;;  %2123 = vmatmul.mubr.bf16.vlgmr.msra.gmra.mrb[0].mxu1 %v2225_v26  ;;  %v853_v25 = vld [vmem:[%s2403_s7 + $0x188] sm:$0xff]  ;;  %v852_v26 = vld [vmem:[%s2403_s7 + $0x180] sm:$0xff]  ;;  %p2262_p1 = scmp.lt.s32.totalorder %s2260_s24, %s2254_s17 }
  0x38   : > { %2094 = vmatprep.mubr.bf16.mxu0 %v2226_v27  ;;  %2126 = vmatprep.mubr.bf16.mxu1 %v2227_v28  ;;  %v855_v27 = vld [vmem:[%s2403_s7 + $0x198] sm:$0xff]  ;;  %v854_v28 = vld [vmem:[%s2403_s7 + $0x190] sm:$0xff] }
  0x39   : > { %p2263_p2 = por %p2262_p1, %p2261_p0 }
  0x3a   : > { %945 = vperm.xlu1 %2213, %v819_v29   ;;  %940 = vperm.xlu0 %2212, %v818_v30   ;;  %v857_v29 = vld [vmem:[%s2403_s7 + $0x1a8] sm:$0xff]  ;;  %v856_v30 = vld [vmem:[%s2403_s7 + $0x1a0] sm:$0xff] }
  0x3b   : > { %p2264_p3 = pnand %p2263_p2, %p2257_p13 }
  0x3e   : > { %955 = vperm.xlu1 %2213, %v821_v31   ;;  %950 = vperm.xlu0 %2212, %v820_v32   ;;  %v859_v31 = vld [vmem:[%s2403_s7 + $0x1b8] sm:$0xff]  ;;  %v858_v32 = vld [vmem:[%s2403_s7 + $0x1b0] sm:$0xff] }
  0x3f   : > { %2095 = vmatmul.mubr.bf16.gmra.mrb[4].mxu0 %v2228_v33  ;;  %2127 = vmatmul.mubr.bf16.gmra.mrb[4].mxu1 %v2229_v34  ;;  %v861_v33 = vld [vmem:[%s2403_s7 + $0x1c8] sm:$0xff]  ;;  %v860_v34 = vld [vmem:[%s2403_s7 + $0x1c0] sm:$0xff] }
  0x40   : > { %2098 = vmatprep.mubr.bf16.mxu0 %v2230_v35  ;;  %2130 = vmatprep.mubr.bf16.mxu1 %v2231_v36  ;;  %v863_v35 = vld [vmem:[%s2403_s7 + $0x1d8] sm:$0xff]  ;;  %v862_v36 = vld [vmem:[%s2403_s7 + $0x1d0] sm:$0xff] }
  0x42   : > { %965 = vperm.xlu1 %2213, %v823_v37   ;;  %960 = vperm.xlu0 %2212, %v822_v38   ;;  %v865_v37 = vld [vmem:[%s2403_s7 + $0x1e8] sm:$0xff]  ;;  %v864_v38 = vld [vmem:[%s2403_s7 + $0x1e0] sm:$0xff] }
  0x46   : > { %975 = vperm.xlu1 %2213, %v825_v39   ;;  %970 = vperm.xlu0 %2212, %v824_v40   ;;  %v867_v39 = vld [vmem:[%s2403_s7 + $0x1f8] sm:$0xff]  ;;  %v866_v40 = vld [vmem:[%s2403_s7 + $0x1f0] sm:$0xff]  ;;  %s1842_s7 = sshll.u32 %s2363_s16, 12 }
  0x47   : > { %2099 = vmatmul.mubr.bf16.gmra.mrb[8].mxu0 %v2232_v41  ;;  %2131 = vmatmul.mubr.bf16.gmra.mrb[8].mxu1 %v2233_v42  ;;  %s2700_s10 = scalar_lea.hbm %s2754_s3, %s1842_s7 }
  0x48   : > { %2102 = vmatprep.mubr.bf16.mxu0 %v2234_v43  ;;  %2134 = vmatprep.mubr.bf16.mxu1 %v2235_v44 }
  0x4a   : > { %985 = vperm.xlu1 %2213, %v827_v45   ;;  %980 = vperm.xlu0 %2212, %v826_v46  }
  0x4e   : > { %995 = vperm.xlu1 %2213, %v829_v47   ;;  %990 = vperm.xlu0 %2212, %v828_v48  }
  0x4f   : > { %2103 = vmatmul.mubr.bf16.gmra.mrb[12].mxu0 %v2236_v49  ;;  %2135 = vmatmul.mubr.bf16.gmra.mrb[12].mxu1 %v2237_v50 }
  0x50   : > { %2106 = vmatprep.mubr.bf16.mxu0 %v2238_v51  ;;  %2138 = vmatprep.mubr.bf16.mxu1 %v2239_v52 }
  0x52   : > { %1005 = vperm.xlu1 %2213, %v831_v53   ;;  %1000 = vperm.xlu0 %2212, %v830_v54  }
  0x56   : > { %1015 = vperm.xlu1 %2213, %v833_v55   ;;  %1010 = vperm.xlu0 %2212, %v832_v56  }
  0x57   : > { %2107 = vmatmul.mubr.bf16.gmra.mrb[16].mxu0 %v2240_v57  ;;  %2139 = vmatmul.mubr.bf16.gmra.mrb[16].mxu1 %v2241_v58 }
  0x58   : > { %2110 = vmatprep.mubr.bf16.mxu0 %v2242_v59  ;;  %2142 = vmatprep.mubr.bf16.mxu1 %v2243_v60 }
  0x5a   : > { %1025 = vperm.xlu1 %2213, %v835_v61   ;;  %1020 = vperm.xlu0 %2212, %v834_v62  }
  0x5e   : > { %1035 = vperm.xlu1 %2213, %v837_v63   ;;  %1030 = vperm.xlu0 %2212, %v836_v0  }
  0x5f   : > { %2111 = vmatmul.mubr.bf16.gmra.mrb[20].mxu0 %v2244_v1  ;;  %2143 = vmatmul.mubr.bf16.gmra.mrb[20].mxu1 %v2245_v2 }
  0x60   : > { %2114 = vmatprep.mubr.bf16.mxu0 %v2246_v3  ;;  %2146 = vmatprep.mubr.bf16.mxu1 %v2247_v4 }
  0x62   : > { %1045 = vperm.xlu1 %2213, %v839_v5   ;;  %1040 = vperm.xlu0 %2212, %v838_v6  }
  0x66   : > { %1055 = vperm.xlu1 %2213, %v841_v7   ;;  %1050 = vperm.xlu0 %2212, %v840_v8  }
  0x67   : > { %2115 = vmatmul.mubr.bf16.gmra.mrb[24].mxu0 %v2248_v9  ;;  %2147 = vmatmul.mubr.bf16.gmra.mrb[24].mxu1 %v2249_v10 }
  0x68   : > { %2118 = vmatprep.mubr.bf16.mxu0 %v2250_v11  ;;  %2150 = vmatprep.mubr.bf16.mxu1 %v2251_v12 }
  0x6a   : > { %1065 = vperm.xlu1 %2213, %v843_v13   ;;  %1060 = vperm.xlu0 %2212, %v842_v14  }
  0x6e   : > { %1075 = vperm.xlu1 %2213, %v845_v15   ;;  %1070 = vperm.xlu0 %2212, %v844_v16  }
  0x6f   : > { %2119 = vmatmul.mubr.bf16.gmra.mrb[28].mxu0 %v2252_v17  ;;  %2151 = vmatmul.mubr.bf16.gmra.mrb[28].mxu1 %v2253_v18 }
  0x72   : > { %1085 = vperm.xlu1 %2213, %v847_v19   ;;  %1080 = vperm.xlu0 %2212, %v846_v20  }
  0x76   : > { %1095 = vperm.xlu1 %2213, %v849_v21   ;;  %1090 = vperm.xlu0 %2212, %v848_v22  }
  0x7a   : > { %1105 = vperm.xlu1 %2213, %v851_v23   ;;  %1100 = vperm.xlu0 %2212, %v850_v24  }
  0x7e   : > { %1115 = vperm.xlu1 %2213, %v853_v25   ;;  %1110 = vperm.xlu0 %2212, %v852_v26  }
  0x82   : > { %1125 = vperm.xlu1 %2213, %v855_v27   ;;  %1120 = vperm.xlu0 %2212, %v854_v28  }
  0x86   : > { %1135 = vperm.xlu1 %2213, %v857_v29   ;;  %1130 = vperm.xlu0 %2212, %v856_v30  }
  0x8a   : > { %1145 = vperm.xlu1 %2213, %v859_v31   ;;  %1140 = vperm.xlu0 %2212, %v858_v32  }
  0x8e   : > { %1155 = vperm.xlu1 %2213, %v861_v33   ;;  %1150 = vperm.xlu0 %2212, %v860_v34  }
  0x92   : > { %1165 = vperm.xlu1 %2213, %v863_v35   ;;  %1160 = vperm.xlu0 %2212, %v862_v36  }
  0x96   : > { %1175 = vperm.xlu1 %2213, %v865_v37   ;;  %1170 = vperm.xlu0 %2212, %v864_v38  }
  0x9a   : > { %1185 = vperm.xlu1 %2213, %v867_v39   ;;  %1180 = vperm.xlu0 %2212, %v866_v40  }
  0x9d   : > { %v881_v41 = vpop.permute.xlu1 %880  ;;  %v871_v42 = vpop.permute.xlu0 %870 }
  0xa1   : > { %v886_v43 = vpop.permute.xlu1 %885  ;;  %v2521_v44 = vpop.permute.xlu0 %875 }
  0xa5   : > { %v2523_v45 = vpop.permute.xlu1 %895  ;;  %v2525_v46 = vpop.permute.xlu0 %890 }
  0xa9   : > { %v2527_v47 = vpop.permute.xlu1 %905  ;;  %v2529_v48 = vpop.permute.xlu0 %900 }
  0xad   : > { %v2531_v49 = vpop.permute.xlu1 %915  ;;  %v2533_v50 = vpop.permute.xlu0 %910 }
  0xb1   : > { %v2535_v51 = vpop.permute.xlu1 %925  ;;  %v2537_v52 = vpop.permute.xlu0 %920 }
  0xb5   : > { %v2539_v53 = vpop.permute.xlu1 %935  ;;  %v2541_v54 = vpop.permute.xlu0 %930 }
  0xb9   : > { %v2543_v55 = vpop.permute.xlu1 %945  ;;  %v2545_v56 = vpop.permute.xlu0 %940 }
  0xbd   : > { %v2547_v57 = vpop.permute.xlu1 %955  ;;  %v2549_v58 = vpop.permute.xlu0 %950 }
  0xc1   : > { %v2551_v59 = vpop.permute.xlu1 %965  ;;  %v2553_v60 = vpop.permute.xlu0 %960 }
  0xc5   : > { %v2555_v61 = vpop.permute.xlu1 %975  ;;  %v2557_v62 = vpop.permute.xlu0 %970 }
  0xc9   : > { %v2559_v63 = vpop.permute.xlu1 %985  ;;  %v2561_v0 = vpop.permute.xlu0 %980 }
  0xcd   : > { %v2563_v1 = vpop.permute.xlu1 %995  ;;  %v2565_v2 = vpop.permute.xlu0 %990 }
  0xce   : > { %2757 = vst [vmem:[#allocation5_spill] sm:$0xff] %v2563_v1  ;;  %2758 = vst [vmem:[#allocation6_spill] sm:$0xff] %v2565_v2 }
  0xd1   : > { %v2567_v3 = vpop.permute.xlu1 %1005  ;;  %v2569_v4 = vpop.permute.xlu0 %1000 }
  0xd5   : > { %v2571_v5 = vpop.permute.xlu1 %1015  ;;  %v2573_v6 = vpop.permute.xlu0 %1010 }
  0xd6   : > { %2759 = vst [vmem:[#allocation7_spill] sm:$0xff] %v2571_v5  ;;  %2760 = vst [vmem:[#allocation8_spill] sm:$0xff] %v2573_v6 }
  0xd9   : > { %v2575_v7 = vpop.permute.xlu1 %1025  ;;  %v2577_v8 = vpop.permute.xlu0 %1020 }
  0xda   : > { %2761 = vst [vmem:[#allocation9_spill] sm:$0xff] %v2575_v7  ;;  %2762 = vst [vmem:[#allocation10_spill] sm:$0xff] %v2577_v8 }
  0xdd   : > { %v1036_v9 = vpop.permute.xlu1 %1035  ;;  %v1031_v10 = vpop.permute.xlu0 %1030 }
  0xe1   : > { %v1046_v11 = vpop.permute.xlu1 %1045  ;;  %v1041_v12 = vpop.permute.xlu0 %1040 }
  0xe5   : > { %v1056_v13 = vpop.permute.xlu1 %1055  ;;  %v1051_v14 = vpop.permute.xlu0 %1050 }
  0xe9   : > { %v1066_v15 = vpop.permute.xlu1 %1065  ;;  %v1061_v16 = vpop.permute.xlu0 %1060 }
  0xed   : > { %v2579_v17 = vpop.permute.xlu1 %1075  ;;  %v2581_v18 = vpop.permute.xlu0 %1070 }
  0xf1   : > { %v2583_v19 = vpop.permute.xlu1 %1085  ;;  %v2585_v20 = vpop.permute.xlu0 %1080 }
  0xf5   : > { %v2587_v21 = vpop.permute.xlu1 %1095  ;;  %v2589_v22 = vpop.permute.xlu0 %1090 }
  0xf9   : > { %v2591_v23 = vpop.permute.xlu1 %1105  ;;  %v2593_v24 = vpop.permute.xlu0 %1100 }
  0xfd   : > { %v2596_v25 = vpop.permute.xlu1 %1115  ;;  %v2598_v26 = vpop.permute.xlu0 %1110 }
 0x101   : > { %v2603_v1 = vpop.permute.xlu1 %1125  ;;  %v2605_v2 = vpop.permute.xlu0 %1120 }
 0x10a   : > { %v2092_v27 = vpop.f32.mrb[0].mxu0  ;;  %v2124_v28 = vpop.f32.mrb[0].mxu1 }
 0x10b   : > { %v549_v29 = vpop.f32.mrb[1].mxu0  ;;  %v677_v30 = vpop.f32.mrb[1].mxu1  ;;  %v1190_v33 = vmul.f32 %v2092_v27, %v881_v41  ;;  %v1222_v34 = vmul.f32 %v2124_v28, %v1041_v12 }
 0x10c   : > { %v2093_v31 = vpop.f32.mrb[2].mxu0  ;;  %v2125_v32 = vpop.f32.mrb[2].mxu1  ;;  %v1188_v37 = vmul.f32 %v871_v42, %v549_v29  ;;  %v1220_v38 = vmul.f32 %v1031_v10, %v677_v30 }
 0x10d   : > { %v1191_v35 = vmul.f32 %v2093_v31, %v886_v43  ;;  %v1223_v36 = vmul.f32 %v2125_v32, %v1046_v11  ;;  %v552_v39 = vpop.f32.mrb[3].mxu0  ;;  %v680_v40 = vpop.f32.mrb[3].mxu1 }
 0x10e   : > { %v1189_v7 = vmul.f32 %v2521_v44, %v552_v39  ;;  %v1221_v8 = vmul.f32 %v1036_v9, %v680_v40 }
 0x10f   : > { %v1851_v5 = vpack.c.bf16 %v1191_v35, %v1190_v33  ;;  %v1931_v6 = vpack.c.bf16 %v1223_v36, %v1222_v34  ;;  %v2617_v34 = vpop.permute.xlu1 %1135  ;;  %v2619_v35 = vpop.permute.xlu0 %1130 }
 0x110   : > { %v1846_v41 = vpack.c.bf16 %v1189_v7, %v1188_v37  ;;  %v1926_v42 = vpack.c.bf16 %v1221_v8, %v1220_v38 }
 0x111   : > { %2003 = vst [vmem:[%s2607_s6 + $0x8] sm:$0xff] %v1851_v5   ;;  %2019 = vst [vmem:[%s2607_s6 + $0x88] sm:$0xff] %v1931_v6  }
 0x112   : > { %v2096_v43 = vpop.f32.mrb[4].mxu0  ;;  %v2128_v10 = vpop.f32.mrb[4].mxu1  ;;  %1847 = vst [vmem:[%s2607_s6] sm:$0xff] %v1846_v41   ;;  %2018 = vst [vmem:[%s2607_s6 + $0x80] sm:$0xff] %v1926_v42  }
 0x113   : > { %v1194_v44 = vmul.f32 %v2096_v43, %v2529_v48  ;;  %v565_v9 = vpop.f32.mrb[5].mxu0  ;;  %v693_v11 = vpop.f32.mrb[5].mxu1  ;;  %v1226_v28 = vmul.f32 %v2128_v10, %v1061_v16 }
 0x114   : > { %v2097_v12 = vpop.f32.mrb[6].mxu0  ;;  %v2129_v27 = vpop.f32.mrb[6].mxu1  ;;  %v1192_v5 = vmul.f32 %v2525_v46, %v565_v9  ;;  %v1224_v6 = vmul.f32 %v1051_v14, %v693_v11 }
 0x115   : > { %v1195_v29 = vmul.f32 %v2097_v12, %v2527_v47  ;;  %v1227_v30 = vmul.f32 %v2129_v27, %v1066_v15  ;;  %v568_v7 = vpop.f32.mrb[7].mxu0  ;;  %v696_v8 = vpop.f32.mrb[7].mxu1 }
 0x116   : > { %v1193_v48 = vmul.f32 %v2523_v45, %v568_v7  ;;  %v1225_v33 = vmul.f32 %v1056_v13, %v696_v8  ;;  %v2633_v27 = vpop.permute.xlu1 %1145 }
 0x117   : > { %v1861_v31 = vpack.c.bf16 %v1195_v29, %v1194_v44  ;;  %v1941_v32 = vpack.c.bf16 %v1227_v30, %v1226_v28 }
 0x118   : > { %v1856_v47 = vpack.c.bf16 %v1193_v48, %v1192_v5  ;;  %v1936_v15 = vpack.c.bf16 %v1225_v33, %v1224_v6 }
 0x119   : > { %2005 = vst [vmem:[%s2607_s6 + $0x18] sm:$0xff] %v1861_v31   ;;  %2021 = vst [vmem:[%s2607_s6 + $0x98] sm:$0xff] %v1941_v32  }
 0x11a   : > { %v2100_v16 = vpop.f32.mrb[8].mxu0  ;;  %v2132_v46 = vpop.f32.mrb[8].mxu1  ;;  %2004 = vst [vmem:[%s2607_s6 + $0x10] sm:$0xff] %v1856_v47   ;;  %2020 = vst [vmem:[%s2607_s6 + $0x90] sm:$0xff] %v1936_v15  }
 0x11b   : > { %v1198_v14 = vmul.f32 %v2100_v16, %v2537_v52  ;;  %v581_v36 = vpop.f32.mrb[9].mxu0  ;;  %v709_v37 = vpop.f32.mrb[9].mxu1  ;;  %v1230_v45 = vmul.f32 %v2132_v46, %v2585_v20 }
 0x11c   : > { %v2101_v38 = vpop.f32.mrb[10].mxu0  ;;  %v2133_v39 = vpop.f32.mrb[10].mxu1  ;;  %v1196_v43 = vmul.f32 %v2533_v50, %v581_v36  ;;  %v1228_v52 = vmul.f32 %v2581_v18, %v709_v37 }
 0x11d   : > { %v1199_v13 = vmul.f32 %v2101_v38, %v2535_v51  ;;  %v1231_v40 = vmul.f32 %v2133_v39, %v2583_v19  ;;  %v584_v41 = vpop.f32.mrb[11].mxu0  ;;  %v712_v42 = vpop.f32.mrb[11].mxu1 }
 0x11e   : > { %v1197_v10 = vmul.f32 %v2531_v49, %v584_v41  ;;  %v1229_v44 = vmul.f32 %v2579_v17, %v712_v42  ;;  %v2635_v51 = vpop.permute.xlu0 %1140  ;;  %v2649_v16 = vpop.permute.xlu1 %1155 }
 0x11f   : > { %v1871_v9 = vpack.c.bf16 %v1199_v13, %v1198_v14  ;;  %v1951_v11 = vpack.c.bf16 %v1231_v40, %v1230_v45 }
 0x120   : > { %v1866_v20 = vpack.c.bf16 %v1197_v10, %v1196_v43  ;;  %v1946_v12 = vpack.c.bf16 %v1229_v44, %v1228_v52 }
 0x121   : > { %2007 = vst [vmem:[%s2607_s6 + $0x28] sm:$0xff] %v1871_v9   ;;  %2023 = vst [vmem:[%s2607_s6 + $0xa8] sm:$0xff] %v1951_v11  }
 0x122   : > { %2006 = vst [vmem:[%s2607_s6 + $0x20] sm:$0xff] %v1866_v20   ;;  %2022 = vst [vmem:[%s2607_s6 + $0xa0] sm:$0xff] %v1946_v12   ;;  %v2104_v19 = vpop.f32.mrb[12].mxu0  ;;  %v2136_v50 = vpop.f32.mrb[12].mxu1 }
 0x123   : > { %v1202_v18 = vmul.f32 %v2104_v19, %v2545_v56  ;;  %v597_v28 = vpop.f32.mrb[13].mxu0  ;;  %v725_v49 = vpop.f32.mrb[13].mxu1  ;;  %v1234_v30 = vmul.f32 %v2136_v50, %v2593_v24 }
 0x124   : > { %v2105_v29 = vpop.f32.mrb[14].mxu0  ;;  %v2137_v17 = vpop.f32.mrb[14].mxu1  ;;  %v1200_v31 = vmul.f32 %v2541_v54, %v597_v28  ;;  %v1232_v56 = vmul.f32 %v2589_v22, %v725_v49 }
 0x125   : > { %v1203_v5 = vmul.f32 %v2105_v29, %v2543_v55  ;;  %v1235_v6 = vmul.f32 %v2137_v17, %v2591_v23  ;;  %v600_v7 = vpop.f32.mrb[15].mxu0  ;;  %v728_v8 = vpop.f32.mrb[15].mxu1 }
 0x126   : > { %v1201_v32 = vmul.f32 %v2539_v53, %v600_v7  ;;  %v1233_v48 = vmul.f32 %v2587_v21, %v728_v8  ;;  %v2651_v55 = vpop.permute.xlu0 %1150  ;;  %v1166_v10 = vpop.permute.xlu1 %1165 }
 0x127   : > { %v1881_v33 = vpack.c.bf16 %v1203_v5, %v1202_v18  ;;  %v1961_v47 = vpack.c.bf16 %v1235_v6, %v1234_v30 }
 0x128   : > { %v1876_v24 = vpack.c.bf16 %v1201_v32, %v1200_v31  ;;  %v1956_v15 = vpack.c.bf16 %v1233_v48, %v1232_v56 }
 0x129   : > { %2009 = vst [vmem:[%s2607_s6 + $0x38] sm:$0xff] %v1881_v33   ;;  %2025 = vst [vmem:[%s2607_s6 + $0xb8] sm:$0xff] %v1961_v47   ;;  %v2763_v33 = vld [vmem:[#allocation6_spill] sm:$0xff] }
 0x12a   : > { %2008 = vst [vmem:[%s2607_s6 + $0x30] sm:$0xff] %v1876_v24   ;;  %2024 = vst [vmem:[%s2607_s6 + $0xb0] sm:$0xff] %v1956_v15   ;;  %v2108_v23 = vpop.f32.mrb[16].mxu0  ;;  %v2140_v54 = vpop.f32.mrb[16].mxu1  ;;  %v2764_v15 = vld [vmem:[#allocation5_spill] sm:$0xff] }
 0x12b   : > { %v1206_v22 = vmul.f32 %v2108_v23, %v2553_v60  ;;  %v613_v46 = vpop.f32.mrb[17].mxu0  ;;  %v741_v53 = vpop.f32.mrb[17].mxu1  ;;  %v1238_v36 = vmul.f32 %v2140_v54, %v2605_v2 }
 0x12c   : > { %v2109_v14 = vpop.f32.mrb[18].mxu0  ;;  %v2141_v21 = vpop.f32.mrb[18].mxu1  ;;  %v1204_v13 = vmul.f32 %v2549_v58, %v613_v46  ;;  %v1236_v60 = vmul.f32 %v2598_v26, %v741_v53 }
 0x12d   : > { %v1207_v37 = vmul.f32 %v2109_v14, %v2551_v59  ;;  %v1239_v38 = vmul.f32 %v2141_v21, %v2603_v1  ;;  %v616_v39 = vpop.f32.mrb[19].mxu0  ;;  %v744_v45 = vpop.f32.mrb[19].mxu1 }
 0x12e   : > { %v1205_v40 = vmul.f32 %v2547_v57, %v616_v39  ;;  %v1237_v41 = vmul.f32 %v2596_v25, %v744_v45  ;;  %v1161_v59 = vpop.permute.xlu0 %1160  ;;  %v1176_v5 = vpop.permute.xlu1 %1175 }
 0x12f   : > { %v1891_v42 = vpack.c.bf16 %v1207_v37, %v1206_v22  ;;  %v1971_v43 = vpack.c.bf16 %v1239_v38, %v1238_v36  ;;  %v2765_v37 = vld [vmem:[#allocation10_spill] sm:$0xff] }
 0x130   : > { %v1886_v2 = vpack.c.bf16 %v1205_v40, %v1204_v13  ;;  %v1966_v52 = vpack.c.bf16 %v1237_v41, %v1236_v60  ;;  %v2766_v60 = vld [vmem:[#allocation9_spill] sm:$0xff] }
 0x131   : > { %2011 = vst [vmem:[%s2607_s6 + $0x48] sm:$0xff] %v1891_v42   ;;  %2027 = vst [vmem:[%s2607_s6 + $0xc8] sm:$0xff] %v1971_v43  }
 0x132   : > { %2010 = vst [vmem:[%s2607_s6 + $0x40] sm:$0xff] %v1886_v2   ;;  %2026 = vst [vmem:[%s2607_s6 + $0xc0] sm:$0xff] %v1966_v52   ;;  %v2112_v1 = vpop.f32.mrb[20].mxu0  ;;  %v2144_v44 = vpop.f32.mrb[20].mxu1  ;;  %v2767_v2 = vld [vmem:[#allocation8_spill] sm:$0xff] }
 0x133   : > { %v1210_v58 = vmul.f32 %v2112_v1, %v2561_v0  ;;  %v629_v9 = vpop.f32.mrb[21].mxu0  ;;  %v757_v26 = vpop.f32.mrb[21].mxu1  ;;  %v1242_v25 = vmul.f32 %v2144_v44, %v2635_v51 }
 0x134   : > { %v2113_v11 = vpop.f32.mrb[22].mxu0  ;;  %v2145_v57 = vpop.f32.mrb[22].mxu1  ;;  %v1208_v18 = vmul.f32 %v2557_v62, %v629_v9  ;;  %v1240_v0 = vmul.f32 %v2619_v35, %v757_v26 }
 0x135   : > { %v1211_v20 = vmul.f32 %v2113_v11, %v2559_v63  ;;  %v1243_v12 = vmul.f32 %v2145_v57, %v2633_v27  ;;  %v632_v19 = vpop.f32.mrb[23].mxu0  ;;  %v760_v50 = vpop.f32.mrb[23].mxu1 }
 0x136   : > { %v1209_v28 = vmul.f32 %v2555_v61, %v632_v19  ;;  %v1241_v49 = vmul.f32 %v2617_v34, %v760_v50  ;;  %v1171_v63 = vpop.permute.xlu0 %1170 }
 0x137   : > { %v1901_v29 = vpack.c.bf16 %v1211_v20, %v1210_v58  ;;  %v1981_v17 = vpack.c.bf16 %v1243_v12, %v1242_v25 }
 0x138   : > { %v1896_v51 = vpack.c.bf16 %v1209_v28, %v1208_v18  ;;  %v1976_v30 = vpack.c.bf16 %v1241_v49, %v1240_v0 }
 0x139   : > { %2013 = vst [vmem:[%s2607_s6 + $0x58] sm:$0xff] %v1901_v29   ;;  %2029 = vst [vmem:[%s2607_s6 + $0xd8] sm:$0xff] %v1981_v17  }
 0x13a   : > { %2012 = vst [vmem:[%s2607_s6 + $0x50] sm:$0xff] %v1896_v51   ;;  %2028 = vst [vmem:[%s2607_s6 + $0xd0] sm:$0xff] %v1976_v30   ;;  %v2116_v27 = vpop.f32.mrb[24].mxu0  ;;  %v2148_v6 = vpop.f32.mrb[24].mxu1 }
 0x13b   : > { %v1214_v62 = vmul.f32 %v2116_v27, %v2569_v4  ;;  %v645_v7 = vpop.f32.mrb[25].mxu0  ;;  %v773_v35 = vpop.f32.mrb[25].mxu1  ;;  %v1246_v34 = vmul.f32 %v2148_v6, %v1161_v59  ;;  %v2768_v59 = vld [vmem:[#allocation7_spill] sm:$0xff] }
 0x13c   : > { %v2117_v8 = vpop.f32.mrb[26].mxu0  ;;  %v2149_v61 = vpop.f32.mrb[26].mxu1  ;;  %v1212_v47 = vmul.f32 %v2763_v33, %v645_v7  ;;  %v1244_v24 = vmul.f32 %v2651_v55, %v773_v35 }
 0x13d   : > { %v1215_v31 = vmul.f32 %v2117_v8, %v2567_v3  ;;  %v1247_v56 = vmul.f32 %v2149_v61, %v1166_v10  ;;  %v648_v32 = vpop.f32.mrb[27].mxu0  ;;  %v776_v48 = vpop.f32.mrb[27].mxu1 }
 0x13e   : > { %v1213_v4 = vmul.f32 %v2764_v15, %v648_v32  ;;  %v1245_v23 = vmul.f32 %v2649_v16, %v776_v48  ;;  %v1186_v3 = vpop.permute.xlu1 %1185  ;;  %v1181_v14 = vpop.permute.xlu0 %1180 }
 0x13f   : > { %v1911_v54 = vpack.c.bf16 %v1215_v31, %v1214_v62  ;;  %v1991_v22 = vpack.c.bf16 %v1247_v56, %v1246_v34 }
 0x140   : > { %v1906_v46 = vpack.c.bf16 %v1213_v4, %v1212_v47  ;;  %v1986_v53 = vpack.c.bf16 %v1245_v23, %v1244_v24 }
 0x141   : > { %2015 = vst [vmem:[%s2607_s6 + $0x68] sm:$0xff] %v1911_v54   ;;  %2031 = vst [vmem:[%s2607_s6 + $0xe8] sm:$0xff] %v1991_v22  }
 0x142   : > { %2014 = vst [vmem:[%s2607_s6 + $0x60] sm:$0xff] %v1906_v46   ;;  %2030 = vst [vmem:[%s2607_s6 + $0xe0] sm:$0xff] %v1986_v53   ;;  %v2120_v21 = vpop.f32.mrb[28].mxu0  ;;  %v2152_v36 = vpop.f32.mrb[28].mxu1 }
 0x143   : > { %v1218_v55 = vmul.f32 %v2120_v21, %v2765_v37  ;;  %v661_v38 = vpop.f32.mrb[29].mxu0  ;;  %v789_v39 = vpop.f32.mrb[29].mxu1  ;;  %v1250_v13 = vmul.f32 %v2152_v36, %v1181_v14 }
 0x144   : > { %v2121_v45 = vpop.f32.mrb[30].mxu0  ;;  %v2153_v16 = vpop.f32.mrb[30].mxu1  ;;  %v1216_v52 = vmul.f32 %v2767_v2, %v661_v38  ;;  %v1248_v10 = vmul.f32 %v1171_v63, %v789_v39 }
 0x145   : > { %v1219_v40 = vmul.f32 %v2121_v45, %v2766_v60  ;;  %v1251_v41 = vmul.f32 %v2153_v16, %v1186_v3  ;;  %v664_v42 = vpop.f32.mrb[31].mxu0  ;;  %v792_v43 = vpop.f32.mrb[31].mxu1 }
 0x146   : > { %v1217_v1 = vmul.f32 %v2768_v59, %v664_v42  ;;  %v1249_v44 = vmul.f32 %v1176_v5, %v792_v43 }
 0x147   : > { %v1921_v58 = vpack.c.bf16 %v1219_v40, %v1218_v55  ;;  %v2001_v9 = vpack.c.bf16 %v1251_v41, %v1250_v13 }
 0x148   : > { %v1916_v26 = vpack.c.bf16 %v1217_v1, %v1216_v52  ;;  %v1996_v11 = vpack.c.bf16 %v1249_v44, %v1248_v10 }
 0x149   : > { %2017 = vst [vmem:[%s2607_s6 + $0x78] sm:$0xff] %v1921_v58   ;;  %2033 = vst [vmem:[%s2607_s6 + $0xf8] sm:$0xff] %v2001_v9  }
 0x14a   : > { %2016 = vst [vmem:[%s2607_s6 + $0x70] sm:$0xff] %v1916_v26   ;;  %2032 = vst [vmem:[%s2607_s6 + $0xf0] sm:$0xff] %v1996_v11  }
 0x14b   : > { %2267 = shalt.err (!%p2264_p3)
}
 0x14c   : > { %s2268_s25 = scalar_lea.hbm %s2700_s10, 4096  ;;  %s2272_s28 = scalar_lea.hbm %s2754_s3, 8192 }
 0x14d   : > { %p2269_p4 = scmp.ne.s32.totalorder %s2700_s10, %s2268_s25  ;;  %p2273_p9 = scmp.lt.u32.totalorder %s2700_s10, %s2754_s3 }
 0x14e   : > { %p2274_p10 = scmp.lt.u32.totalorder %s2272_s28, %s2268_s25  ;;  %p2276_p12 = scmp.lt.u32.totalorder %s2268_s25, %s2700_s10 }
 0x14f   : > { %p2270_p7 = pnand %p2269_p4, %p2380_p5 }
 0x150   : > { %p2275_p11 = por %p2274_p10, %p2273_p9 }
 0x151   : > { %p2271_p8 = pneg %p2270_p7 }
 0x152   : > { %p2277_p13 = por %p2276_p12, %p2275_p11 }
 0x154   : > { %p2278_p0 = pnand %p2277_p13, %p2271_p8 }
 0x156   : > { %2281 = shalt.err (!%p2278_p0)
}
 0x157   : > { %s2320_s4 = smov 64   ;;  %s2321_s5 = smov 4  }
 0x158   : > { %2170 = dma.vmem_to_hbm [thread:$0]  (%p2380_p5), %s2702_s8, 4096, %s2700_s10, %s2710_s11, %s2320_s4, %s2320_s4, %s2321_s5  }
 0x159 PF: > { %p2176_p1 = scmp.ge.s32.totalorder %s2316_s15, 2  ;;  %s1601_s6 = sand.u32 1, %s2304_s12  }
 0x15a   : > { %s1602_s7 = scalar_lea.sflag [#allocation3], %s1601_s6 }
 0x15b   : > { %p2173_p2 = pnand %p2176_p1, %p2384_p6 }
 0x15d   : > { %2299 = dma.done.wait (!%p2173_p2), %s1602_s7, 4096  }
 0x15e   : > { %2301 = vsyncadd (!%p2173_p2), %s1602_s7, 4294963200  ;;  %p13_p3 = scmp.ge.s32.totalorder %s2367_s18, 4   ;;  %s2769_s12 = smov %s2308_s13 }
 0x15f   : > { %s2770_s13 = smov %s2312_s14  ;;  %s2771_s14 = smov %s2378_s21 }
 0x160   : > { %s2772_s15 = smov %s2367_s18  ;;  %15 = sbr.rel (!%p13_p3) target bundleno = 3 (0x3), region = 70 }
 0x167   :  { %1607 = vsyncpa [#allocation3], 1 }
 0x168   :  { %1609 = vsyncpa [#allocation3 + $0x1], 1 }

</bundles_post_ra>
